<compile_context>
chip_gen: v6e
topology: v6e:2x2x1
jax: 0.10.0
libtpu: 0.0.40
codegen_flags: <defaults>
</compile_context>

<pallas_src>
import jax
import jax.numpy as jnp
from jax.experimental import pallas as pl
from jax.experimental.pallas import tpu as pltpu


def _mlp_value_kernel(x_ref, w1_ref, b1_ref, w2_ref, b2_ref, w3_ref, o_ref):
    # x:(TB,D) w1:(D,H1) b1:(1,H1) w2:(H1,H2) b2:(1,H2) w3:(H2,1) o:(TB,1)
    # MXU matmuls with f32 accumulation; bias + ReLU on the VPU in f32.
    h1 = jnp.dot(x_ref[...], w1_ref[...], preferred_element_type=jnp.float32)
    h1 = jnp.maximum(h1 + b1_ref[...], 0.0)

    h2 = jnp.dot(h1.astype(w2_ref.dtype), w2_ref[...],
                 preferred_element_type=jnp.float32)
    h2 = jnp.maximum(h2 + b2_ref[...], 0.0)

    # Final layer: (TB,H2) @ (H2,1) -> (TB,1).  N=1 on the MXU is ~one result
    # column; the (TB,1) store is masked but tiny (<=8 KB/step) and avoids any
    # hidden XLU transpose of the h2 tile.  b3 is added in the wrapper.
    v = jnp.dot(h2.astype(w3_ref.dtype), w3_ref[...],
                preferred_element_type=jnp.float32)
    o_ref[...] = v.astype(o_ref.dtype)


def _pick_tile_b(B, *, min_steps=1, max_tile=2048):
    """Batch tile: largest multiple of 128 dividing B, capped at `max_tile`
    rows and (when min_steps>1, e.g. v7x core-parallel) at B // min_steps.

    Grid steps are a sequential loop on single-TensorCore chips, so one big
    tile beats many small ones for this overhead-dominated kernel; per-row f32
    intermediates are only (H1+H2)*4 bytes, so even 2048-row tiles are a few
    MiB of VMEM.
    """
    if B % 128 != 0:
        return B          # single full-batch tile (legal; masked stores)
    cap = min(max_tile, B)
    if min_steps > 1:
        cap = max(128, min(cap, B // min_steps))
    best = 128
    for t in range(256, cap + 1, 128):
        if B % t == 0:
            best = t
    return best


def _padded_bytes(shape2d, dtype, buffers):
    """VMEM bytes of a 2-D block, rounded up to the (sublane,128-lane) tile
    the compiler actually allocates (f32: (8,128); bf16: (16,128))."""
    r, c = shape2d
    itemsize = jnp.dtype(dtype).itemsize
    sublane = max(8, 32 // itemsize)
    r_pad = -(-r // sublane) * sublane
    c_pad = -(-c // 128) * 128
    return buffers * r_pad * c_pad * itemsize


def mlp_value_forward(obs, goal, params, *, tile_b=None,
                      compute_dtype=jnp.bfloat16,
                      core_parallel=False,
                      single_buffer_weights=False):
    """Pallas implementation of MLPValueNetwork.forward.

    obs:  [B, obs_dim], goal: [B, goal_dim]  (any float dtype)
    params: [(W1[in,H1], b1[1,H1]), (W2[H1,H2], b2[1,H2]), (W3[H2,1], b3[1,1])]
    compute_dtype: MXU-operand dtype.  bf16 is the default on every TPU
        generation (v5e/v6e/v7x MXUs are bf16-native); accumulation, bias adds
        and ReLUs stay float32.  Pass jnp.float32 for strict f32 parity with
        the PyTorch module (1e-4; use lax.Precision.HIGHEST if bit-exactness
        beyond that is ever required).
    core_parallel: v7x only — keep >=2 batch tiles and shard them over the two
        TensorCores via CORE_PARALLEL.
    single_buffer_weights: drop the double-buffer on the grid-constant weight
        blocks (worth it only for very large hidden sizes on v7x's 64 MiB VMEM).
    returns: [B] float32
    """
    (w1, b1), (w2, b2), (w3, b3) = params
    obs = jnp.asarray(obs, jnp.float32)
    goal = jnp.asarray(goal, jnp.float32)
    B, Do = obs.shape
    Bg, Dg = goal.shape
    assert B == Bg, "obs/goal batch mismatch"
    Din = Do + Dg
    H1, H2 = w1.shape[1], w2.shape[1]
    assert w1.shape[0] == Din and w2.shape[0] == H1 and w3.shape[0] == H2

    # Layer-1 fusion: one (B, Din) operand and a single W1 matmul.
    x = jnp.concatenate([obs, goal], axis=-1).astype(compute_dtype)
    w1c = w1.astype(compute_dtype)
    w2c = w2.astype(compute_dtype)
    w3c = jnp.reshape(w3, (H2, 1)).astype(compute_dtype)
    b1f = jnp.reshape(b1, (1, H1)).astype(jnp.float32)
    b2f = jnp.reshape(b2, (1, H2)).astype(jnp.float32)

    if tile_b is None:
        tile_b = _pick_tile_b(B, min_steps=2 if core_parallel else 1)
    assert B % tile_b == 0, "batch must be a multiple of tile_b"
    assert tile_b == B or tile_b % 128 == 0, (
        "tile_b must be a multiple of 128 or the full batch")
    grid = (B // tile_b,)

    # Grid-constant (weight/bias) blocks; optionally single-buffered.
    def const_spec(shape):
        if single_buffer_weights:
            return pl.BlockSpec(shape, lambda i: (0, 0),
                                pipeline_mode=pl.Buffered(1))
        return pl.BlockSpec(shape, lambda i: (0, 0))

    in_specs = [
        pl.BlockSpec((tile_b, Din), lambda i: (i, 0)),   # x tile
        const_spec((Din, H1)),                           # W1
        const_spec((1, H1)),                             # b1
        const_spec((H1, H2)),                            # W2
        const_spec((1, H2)),                             # b2
        const_spec((H2, 1)),                             # W3
    ]
    out_specs = pl.BlockSpec((tile_b, 1), lambda i: (i, 0))

    # Padding-aware VMEM estimate: input/output tiles double-buffered, weights
    # per `single_buffer_weights`, plus the f32 h1/h2 intermediates.
    wbuf = 1 if single_buffer_weights else 2
    vmem_est = (
        _padded_bytes((tile_b, Din), compute_dtype, 2)        # x tile
        + _padded_bytes((tile_b, 1), jnp.float32, 2)          # output tile
        + _padded_bytes((Din, H1), compute_dtype, wbuf)
        + _padded_bytes((1, H1), jnp.float32, wbuf)
        + _padded_bytes((H1, H2), compute_dtype, wbuf)
        + _padded_bytes((1, H2), jnp.float32, wbuf)
        + _padded_bytes((H2, 1), compute_dtype, wbuf)
        + _padded_bytes((tile_b, H1), jnp.float32, 1)         # h1
        + _padded_bytes((tile_b, H2), jnp.float32, 1))        # h2
    # Only override the scoped-VMEM default when actually needed; stay within
    # v7x's 64 MiB physical VMEM.
    vmem_limit = None
    if vmem_est > 28 * 1024 * 1024:
        vmem_limit = min(int(vmem_est * 1.25), 60 * 1024 * 1024)

    if core_parallel and grid[0] >= 2:
        dim_sem = (pltpu.CORE_PARALLEL,)   # v7x: shard batch tiles over 2 TCs
    else:
        dim_sem = ("parallel",)

    itemsize = jnp.dtype(compute_dtype).itemsize
    cost = pl.CostEstimate(
        flops=2 * B * (Din * H1 + H1 * H2 + H2),
        transcendentals=0,
        bytes_accessed=(B * Din * itemsize
                        + (Din * H1 + H1 * H2 + H2) * itemsize
                        + (H1 + H2) * 4
                        + B * 4))

    out = pl.pallas_call(
        _mlp_value_kernel,
        out_shape=jax.ShapeDtypeStruct((B, 1), jnp.float32),
        grid_spec=pltpu.PrefetchScalarGridSpec(
            num_scalar_prefetch=0,
            grid=grid,
            in_specs=in_specs,
            out_specs=out_specs,
        ),
        compiler_params=pltpu.CompilerParams(
            dimension_semantics=dim_sem,
            vmem_limit_bytes=vmem_limit),
        cost_estimate=cost,
    )(x, w1c, b1f, w2c, b2f, w3c)

    # Final bias + squeeze(-1) in the wrapper (XLA fuses the scalar add);
    # keeping b3 out of the kernel saves a padded (1,1) VMEM block + DMA.
    return jnp.reshape(out, (B,)) + jnp.reshape(b3, ()).astype(jnp.float32)


def init_mlp_params(key, sizes):
    """PyTorch-style nn.Linear init; returns [(W[in,out], b[1,out]), ...]."""
    params = []
    for j in range(len(sizes) - 1):
        fan_in, fan_out = sizes[j], sizes[j + 1]
        key, kw, kb = jax.random.split(key, 3)
        bound = 1.0 / jnp.sqrt(jnp.float32(fan_in))
        w = jax.random.uniform(kw, (fan_in, fan_out), jnp.float32,
                               minval=-bound, maxval=bound)
        b = jax.random.uniform(kb, (1, fan_out), jnp.float32,
                               minval=-bound, maxval=bound)
        params.append((w, b))
    return params


def mlp_value_reference(obs, goal, params):
    """Pure-JAX f32 reference of the PyTorch forward (correctness check)."""
    x = jnp.concatenate([obs, goal], axis=-1).astype(jnp.float32)
    (w1, b1), (w2, b2), (w3, b3) = params
    h = jnp.maximum(x @ w1 + b1, 0.0)
    h = jnp.maximum(h @ w2 + b2, 0.0)
    v = h @ w3 + b3
    return jnp.squeeze(v, -1)


if __name__ == "__main__":
    key = jax.random.PRNGKey(0)
    k_obs, k_goal, k_params = jax.random.split(key, 3)

    # Module-default hidden sizes (256, 256); small, deterministic inputs.
    B, obs_dim, goal_dim = 256, 24, 8
    hidden_sizes = (256, 256)

    obs = jax.random.normal(k_obs, (B, obs_dim), jnp.float32)
    goal = jax.random.normal(k_goal, (B, goal_dim), jnp.float32)

    sizes = [obs_dim + goal_dim] + list(hidden_sizes) + [1]
    params = init_mlp_params(k_params, sizes)

    v_ref = mlp_value_reference(obs, goal, params)

    # Default path: bf16 MXU operands, f32 accumulation, single full-batch tile.
    v_bf16 = jax.block_until_ready(mlp_value_forward(obs, goal, params))
    assert v_bf16.shape == (B,)
    assert jnp.allclose(v_bf16, v_ref, atol=5e-2, rtol=5e-2), (v_bf16, v_ref)

    # Strict-f32 path with a 2-step grid (exercises the batch-tiled pipeline).
    v_f32 = jax.block_until_ready(
        mlp_value_forward(obs, goal, params, tile_b=128,
                          compute_dtype=jnp.float32))
    assert v_f32.shape == (B,)
    assert jnp.allclose(v_f32, v_ref, atol=1e-4, rtol=1e-4), (v_f32, v_ref)

    # Ragged batch (not a multiple of 128): single full-batch-tile fallback.
    obs_r, goal_r = obs[:96], goal[:96]
    v_r = jax.block_until_ready(
        mlp_value_forward(obs_r, goal_r, params, compute_dtype=jnp.float32))
    assert v_r.shape == (96,)
    assert jnp.allclose(v_r, v_ref[:96], atol=1e-4, rtol=1e-4), (v_r, v_ref[:96])

    print("KERNEL_OK")
</pallas_src>

<mosaic_0001>
module attributes {stable_mosaic.version = 11 : i64} {
  func.func @_mlp_value_kernel(%arg0: i32, %arg1: memref<256x32xbf16, #tpu.memory_space<vmem>>, %arg2: memref<32x256xbf16, #tpu.memory_space<vmem>>, %arg3: memref<1x256xf32, #tpu.memory_space<vmem>>, %arg4: memref<256x256xbf16, #tpu.memory_space<vmem>>, %arg5: memref<1x256xf32, #tpu.memory_space<vmem>>, %arg6: memref<256x1xbf16, #tpu.memory_space<vmem>>, %arg7: memref<256x1xf32, #tpu.memory_space<vmem>>) attributes {dimension_semantics = [#tpu.dimension_semantics<parallel>], iteration_bounds = array<i64: 1>, scalar_prefetch = 0 : i64, scratch_operands = 0 : i64, tpu.core_type = #tpu.core_type<tc>, window_params = [{transform_indices = @transform_0, window_bounds = array<i64: 256, 32>}, {pipeline_mode = #tpu.pipeline_mode<synchronous>, transform_indices = @transform_1, window_bounds = array<i64: 32, 256>}, {pipeline_mode = #tpu.pipeline_mode<synchronous>, transform_indices = @transform_2, window_bounds = array<i64: 1, 256>}, {pipeline_mode = #tpu.pipeline_mode<synchronous>, transform_indices = @transform_3, window_bounds = array<i64: 256, 256>}, {pipeline_mode = #tpu.pipeline_mode<synchronous>, transform_indices = @transform_4, window_bounds = array<i64: 1, 256>}, {pipeline_mode = #tpu.pipeline_mode<synchronous>, transform_indices = @transform_5, window_bounds = array<i64: 256, 1>}, {transform_indices = @transform_6, window_bounds = array<i64: 256, 1>}]} {
    %c0 = arith.constant 0 : index
    %c0_0 = arith.constant 0 : index
    %0 = vector.load %arg1[%c0, %c0_0] : memref<256x32xbf16, #tpu.memory_space<vmem>>, vector<256x32xbf16>
    %c0_1 = arith.constant 0 : index
    %c0_2 = arith.constant 0 : index
    %1 = vector.load %arg2[%c0_1, %c0_2] : memref<32x256xbf16, #tpu.memory_space<vmem>>, vector<32x256xbf16>
    %cst = arith.constant dense<0.000000e+00> : vector<256x256xf32>
    %2 = tpu.matmul %0, %1, %cst {dimension_numbers = #tpu.dot_dimension_numbers<[1], [0], [0], [1], [0, 0, 1, 1], [], []>} : vector<256x32xbf16>, vector<32x256xbf16>, vector<256x256xf32> -> vector<256x256xf32>
    %c0_3 = arith.constant 0 : index
    %c0_4 = arith.constant 0 : index
    %3 = vector.load %arg3[%c0_3, %c0_4] : memref<1x256xf32, #tpu.memory_space<vmem>>, vector<1x256xf32>
    %4 = vector.broadcast %3 : vector<1x256xf32> to vector<256x256xf32>
    %5 = arith.addf %2, %4 : vector<256x256xf32>
    %cst_5 = arith.constant 0.000000e+00 : f32
    %6 = vector.broadcast %cst_5 : f32 to vector<256x256xf32>
    %7 = arith.maximumf %5, %6 : vector<256x256xf32>
    %8 = arith.truncf %7 : vector<256x256xf32> to vector<256x256xbf16>
    %c0_6 = arith.constant 0 : index
    %c0_7 = arith.constant 0 : index
    %9 = vector.load %arg4[%c0_6, %c0_7] : memref<256x256xbf16, #tpu.memory_space<vmem>>, vector<256x256xbf16>
    %cst_8 = arith.constant dense<0.000000e+00> : vector<256x256xf32>
    %10 = tpu.matmul %8, %9, %cst_8 {dimension_numbers = #tpu.dot_dimension_numbers<[1], [0], [0], [1], [0, 0, 1, 1], [], []>} : vector<256x256xbf16>, vector<256x256xbf16>, vector<256x256xf32> -> vector<256x256xf32>
    %c0_9 = arith.constant 0 : index
    %c0_10 = arith.constant 0 : index
    %11 = vector.load %arg5[%c0_9, %c0_10] : memref<1x256xf32, #tpu.memory_space<vmem>>, vector<1x256xf32>
    %12 = vector.broadcast %11 : vector<1x256xf32> to vector<256x256xf32>
    %13 = arith.addf %10, %12 : vector<256x256xf32>
    %cst_11 = arith.constant 0.000000e+00 : f32
    %14 = vector.broadcast %cst_11 : f32 to vector<256x256xf32>
    %15 = arith.maximumf %13, %14 : vector<256x256xf32>
    %16 = arith.truncf %15 : vector<256x256xf32> to vector<256x256xbf16>
    %c0_12 = arith.constant 0 : index
    %c0_13 = arith.constant 0 : index
    %17 = vector.load %arg6[%c0_12, %c0_13] : memref<256x1xbf16, #tpu.memory_space<vmem>>, vector<256x1xbf16>
    %cst_14 = arith.constant dense<0.000000e+00> : vector<256x1xf32>
    %18 = tpu.matmul %16, %17, %cst_14 {dimension_numbers = #tpu.dot_dimension_numbers<[1], [0], [0], [1], [0, 0, 1, 1], [], []>} : vector<256x256xbf16>, vector<256x1xbf16>, vector<256x1xf32> -> vector<256x1xf32>
    %c0_15 = arith.constant 0 : index
    %c0_16 = arith.constant 0 : index
    %19 = vector.load %arg7[%c0_15, %c0_16] : memref<256x1xf32, #tpu.memory_space<vmem>>, vector<256x1xf32>
    tpu.vector_store %arg7[%c0_15, %c0_16], %18 {strides = array<i32>} : memref<256x1xf32, #tpu.memory_space<vmem>>, vector<256x1xf32>,
    return
  }
  func.func @transform_0(%arg0: i32) -> (i32, i32) {
    %c0_i32 = arith.constant 0 : i32
    %c0_i32_0 = arith.constant 0 : i32
    return %arg0, %c0_i32 : i32, i32
  }
  func.func @transform_1(%arg0: i32) -> (i32, i32) {
    %c0_i32 = arith.constant 0 : i32
    %c0_i32_0 = arith.constant 0 : i32
    %c0_i32_1 = arith.constant 0 : i32
    return %c0_i32, %c0_i32_0 : i32, i32
  }
  func.func @transform_2(%arg0: i32) -> (i32, i32) {
    %c0_i32 = arith.constant 0 : i32
    %c0_i32_0 = arith.constant 0 : i32
    %c0_i32_1 = arith.constant 0 : i32
    return %c0_i32, %c0_i32_0 : i32, i32
  }
  func.func @transform_3(%arg0: i32) -> (i32, i32) {
    %c0_i32 = arith.constant 0 : i32
    %c0_i32_0 = arith.constant 0 : i32
    %c0_i32_1 = arith.constant 0 : i32
    return %c0_i32, %c0_i32_0 : i32, i32
  }
  func.func @transform_4(%arg0: i32) -> (i32, i32) {
    %c0_i32 = arith.constant 0 : i32
    %c0_i32_0 = arith.constant 0 : i32
    %c0_i32_1 = arith.constant 0 : i32
    return %c0_i32, %c0_i32_0 : i32, i32
  }
  func.func @transform_5(%arg0: i32) -> (i32, i32) {
    %c0_i32 = arith.constant 0 : i32
    %c0_i32_0 = arith.constant 0 : i32
    %c0_i32_1 = arith.constant 0 : i32
    return %c0_i32, %c0_i32_0 : i32, i32
  }
  func.func @transform_6(%arg0: i32) -> (i32, i32) {
    %c0_i32 = arith.constant 0 : i32
    %c0_i32_0 = arith.constant 0 : i32
    return %arg0, %c0_i32 : i32, i32
  }
}

</mosaic_0001>

<bundles_post_ra>
// kernel: tpu_custom_call.1
= control target key start
LH: loop header
LB: loop body
LE: loop exit
PB: predicated region body
PF: predicated region fallthrough
CT: control target
= control target key end

     0   :  { %v1616_v1 = vmov 0   ;;  %vm172_vm0 = vcmask 261120   ;;  %v62_v53 = vlaneseq  ;;  %vm1292_vm1 = vcmask 7168   ;;  %s2230_s1 = inlined_call_operand.vmem [shape: bf16[32,256], index: 1, kind: input, shape index: {}]   ;;  %s2231_s0 = inlined_call_operand.vmem [shape: bf16[256,32], index: 0, kind: input, shape index: {}]   ;;  %s2232_s3 = inlined_call_operand.vmem [shape: bf16[256,256], index: 3, kind: input, shape index: {}]   ;;  %s2233_s2 = inlined_call_operand.vmem [shape: f32[1,256], index: 2, kind: input, shape index: {}]   ;;  %s2234_s5 = inlined_call_operand.vmem [shape: bf16[256,1], index: 5, kind: input, shape index: {}]   ;;  %s2235_s4 = inlined_call_operand.vmem [shape: f32[1,256], index: 4, kind: input, shape index: {}]   ;;  %s2236_s6 = inlined_call_operand.vmem [shape: f32[256,1], index: 6, kind: output, shape index: {}]  }
   0x1   :  { %v1530_v0 = vld [vmem:[%s2230_s1 + $0x14] ss:$8 sps:$4 sm:$0xff]   ;;  %253 = vmatprep.mubr.bf16.mxu0 %v1616_v1  ;;  %333 = vmatprep.mubr.bf16.mxu1 %v1616_v1  ;;  %v1532_v2 = vld [vmem:[%s2230_s1 + $0x10] ss:$8 sps:$4 sm:$0xff]   ;;  %v1533_v3 = vld [vmem:[%s2230_s1 + $0x4] ss:$8 sps:$4 sm:$0xff]  }
   0x2   :  { %233 = vmatprep.subr.bf16.mxu0 %v1530_v0  ;;  %1525 = vmatprep.subr.bf16.mxu1 %v1530_v0  ;;  %v1535_v4 = vld [vmem:[%s2230_s1] ss:$8 sps:$4 sm:$0xff]   ;;  %v1552_v9 = vld [vmem:[%s2232_s3 + $0x70] ss:$8 sps:$4 sm:$0xff]   ;;  %v1554_v10 = vld [vmem:[%s2232_s3 + $0x74] ss:$8 sps:$4 sm:$0xff]  }
   0x3   :  { %234 = vmatpush1.bf16.msra.mxu0 %v1532_v2  ;;  %1527 = vmatpush1.bf16.msra.mxu1 %v1532_v2  ;;  %v1536_v5 = vld [vmem:[%s2231_s0] sm:$0xff]   ;;  %v1537_v7 = vld [vmem:[%s2231_s0 + $0x8] sm:$0xff]   ;;  %v1538_v12 = vld [vmem:[%s2231_s0 + $0x10] sm:$0xff]   ;;  %v1840_v54 = vshrl.u32 %v62_v53, 7 }
   0x4   :  { %235 = vmatprep.subr.bf16.mxu0 %v1533_v3  ;;  %1526 = vmatprep.subr.bf16.mxu1 %v1533_v3  ;;  %v1544_v6 = vld [vmem:[%s2231_s0 + $0x40] sm:$0xff]   ;;  %v1545_v8 = vld [vmem:[%s2231_s0 + $0x48] sm:$0xff]   ;;  %v1560_v14 = vld [vmem:[%s2232_s3 + $0x54] ss:$8 sps:$4 sm:$0xff]  }
   0x5   :  { %v1557_v11 = vld [vmem:[%s2232_s3 + $0x64] ss:$8 sps:$4 sm:$0xff]   ;;  %v1555_v13 = vld [vmem:[%s2232_s3 + $0x60] ss:$8 sps:$4 sm:$0xff]   ;;  %v1546_v15 = vld [vmem:[%s2231_s0 + $0x50] sm:$0xff]   ;;  %v68_v55 = vsub.s32 1, %v1840_v54 }
   0x6   :  { %v1558_v16 = vld [vmem:[%s2232_s3 + $0x50] ss:$8 sps:$4 sm:$0xff]   ;;  %v1563_v17 = vld [vmem:[%s2232_s3 + $0x44] ss:$8 sps:$4 sm:$0xff]   ;;  %v1561_v19 = vld [vmem:[%s2232_s3 + $0x40] ss:$8 sps:$4 sm:$0xff]  }
   0x7   :  { %236 = vmatpush1.bf16.msra.mxu0 %v1535_v4  ;;  %1528 = vmatpush1.bf16.msra.mxu1 %v1535_v4  ;;  %v1539_v18 = vld [vmem:[%s2231_s0 + $0x18] sm:$0xff]   ;;  %v1569_v23 = vld [vmem:[%s2232_s3 + $0x24] ss:$8 sps:$4 sm:$0xff]   ;;  %v1567_v25 = vld [vmem:[%s2232_s3 + $0x20] ss:$8 sps:$4 sm:$0xff]   ;;  %v64_v57 = vsub.s32 0, %v1840_v54 }
   0x8   :  { %714 = vmatprep.subr.bf16.mxu1 %v1554_v10  ;;  %v1566_v20 = vld [vmem:[%s2232_s3 + $0x34] ss:$8 sps:$4 sm:$0xff]   ;;  %v1564_v22 = vld [vmem:[%s2232_s3 + $0x30] ss:$8 sps:$4 sm:$0xff]   ;;  %v1540_v24 = vld [vmem:[%s2231_s0 + $0x20] sm:$0xff]  }
   0x9   :  { %v1547_v21 = vld [vmem:[%s2231_s0 + $0x58] sm:$0xff]   ;;  %v1548_v27 = vld [vmem:[%s2231_s0 + $0x60] sm:$0xff]   ;;  %v1541_v30 = vld [vmem:[%s2231_s0 + $0x28] sm:$0xff]  }
   0xa   :  { %1349 = vmatmul.mubr.msk.bf16.vlgmr.msra.gmra.mxu0 %vm172_vm0, %v1536_v5  ;;  %1357 = vmatmul.mubr.msk.bf16.vlgmr.msra.gmra.mxu1 %vm172_vm0, %v1544_v6  ;;  %v1572_v26 = vld [vmem:[%s2232_s3 + $0x14] ss:$8 sps:$4 sm:$0xff]   ;;  %v1570_v28 = vld [vmem:[%s2232_s3 + $0x10] ss:$8 sps:$4 sm:$0xff]   ;;  %v1575_v29 = vld [vmem:[%s2232_s3 + $0x4] ss:$8 sps:$4 sm:$0xff]  }
   0xb   :  { %263 = vmatprep.mubr.bf16.mxu0 %v1616_v1  ;;  %343 = vmatprep.mubr.bf16.mxu1 %v1616_v1  ;;  %v1573_v31 = vld [vmem:[%s2232_s3] ss:$8 sps:$4 sm:$0xff]   ;;  %v1578_v32 = vld [vmem:[%s2232_s3 + $0xf4] ss:$8 sps:$4 sm:$0xff]   ;;  %v1576_v34 = vld [vmem:[%s2232_s3 + $0xf0] ss:$8 sps:$4 sm:$0xff]  }
   0xc   :  { %715 = vmatpush1.bf16.msra.mxu1 %v1552_v9  ;;  %v1549_v33 = vld [vmem:[%s2231_s0 + $0x68] sm:$0xff]   ;;  %v1542_v36 = vld [vmem:[%s2231_s0 + $0x30] sm:$0xff]   ;;  %v1543_v42 = vld [vmem:[%s2231_s0 + $0x38] sm:$0xff]  }
   0xd   :  { %716 = vmatprep.subr.bf16.mxu1 %v1557_v11  ;;  %v1581_v35 = vld [vmem:[%s2232_s3 + $0xe4] ss:$8 sps:$4 sm:$0xff]   ;;  %v1579_v37 = vld [vmem:[%s2232_s3 + $0xe0] ss:$8 sps:$4 sm:$0xff]   ;;  %v1584_v38 = vld [vmem:[%s2232_s3 + $0xd4] ss:$8 sps:$4 sm:$0xff]  }
   0xe   :  { %v1550_v39 = vld [vmem:[%s2231_s0 + $0x70] sm:$0xff]   ;;  %v1587_v41 = vld [vmem:[%s2232_s3 + $0xc4] ss:$8 sps:$4 sm:$0xff]   ;;  %v1585_v43 = vld [vmem:[%s2232_s3 + $0xc0] ss:$8 sps:$4 sm:$0xff]  }
   0xf   :  { %v1582_v40 = vld [vmem:[%s2232_s3 + $0xd0] ss:$8 sps:$4 sm:$0xff]   ;;  %v1590_v44 = vld [vmem:[%s2232_s3 + $0xb4] ss:$8 sps:$4 sm:$0xff]   ;;  %v1593_v47 = vld [vmem:[%s2232_s3 + $0xa4] ss:$8 sps:$4 sm:$0xff]  }
  0x10   :  { %717 = vmatpush1.bf16.msra.mxu1 %v1555_v13  ;;  %v1551_v45 = vld [vmem:[%s2231_s0 + $0x78] sm:$0xff]   ;;  %v1591_v48 = vld [vmem:[%s2232_s3 + $0xa0] ss:$8 sps:$4 sm:$0xff]   ;;  %v1599_v51 = vld [vmem:[%s2232_s3 + $0x84] ss:$8 sps:$4 sm:$0xff]  }
  0x11   :  { %718 = vmatprep.subr.bf16.mxu1 %v1560_v14  ;;  %v1588_v46 = vld [vmem:[%s2232_s3 + $0xb0] ss:$8 sps:$4 sm:$0xff]   ;;  %v1596_v49 = vld [vmem:[%s2232_s3 + $0x94] ss:$8 sps:$4 sm:$0xff]   ;;  %v1597_v52 = vld [vmem:[%s2232_s3 + $0x80] ss:$8 sps:$4 sm:$0xff]  }
  0x12   :  { %1350 = vmatmul.mubr.msk.bf16.gmra.mxu0 %vm172_vm0, %v1537_v7  ;;  %1358 = vmatmul.mubr.msk.bf16.gmra.mxu1 %vm172_vm0, %v1545_v8  ;;  %v1594_v50 = vld [vmem:[%s2232_s3 + $0x90] ss:$8 sps:$4 sm:$0xff]   ;;  %v60_v56 = vld [vmem:[%s2233_s2] sm:$0x3] }
  0x13   :  { %273 = vmatprep.mubr.bf16.mxu0 %v1616_v1  ;;  %353 = vmatprep.mubr.bf16.mxu1 %v1616_v1  ;;  %v1849_v58 = vrot.slane %v60_v56, %v68_v55  ;;  %v1853_v60 = vrot.slane %v60_v56, %v64_v57  ;;  %v1600_v8 = vld [vmem:[%s2234_s5 + $0x78] sm:$0xff]   ;;  %v1602_v14 = vld [vmem:[%s2234_s5 + $0x70] sm:$0xff]  }
  0x14   :  { %719 = vmatpush1.bf16.msra.mxu1 %v1558_v16  ;;  %v1601_v11 = vld [vmem:[%s2234_s5 + $0x38] sm:$0xff]   ;;  %1413 = vmatprep.subr.bf16.mxu0 %v1600_v8 }
  0x15   :  { %720 = vmatprep.subr.bf16.mxu1 %v1563_v17  ;;  %1414 = vmatpush3.bf16.msra.mxu0 %v1601_v11  ;;  %v1603_v17 = vld [vmem:[%s2234_s5 + $0x30] sm:$0xff]  }
  0x16   :  { %1415 = vmatprep.subr.bf16.mxu0 %v1602_v14  ;;  %v1613_v14 = vld [vmem:[%s2234_s5 + $0x8] sm:$0xff]  }
  0x18   :  { %721 = vmatpush1.bf16.msra.mxu1 %v1561_v19 }
  0x19   :  { %722 = vmatprep.subr.bf16.mxu1 %v1566_v20  ;;  %v1604_v20 = vld [vmem:[%s2234_s5 + $0x68] sm:$0xff]   ;;  %1416 = vmatpush3.bf16.msra.mxu0 %v1603_v17 }
  0x1a   :  { %1351 = vmatmul.mubr.msk.bf16.gmra.mxu0 %vm172_vm0, %v1538_v12  ;;  %1359 = vmatmul.mubr.msk.bf16.gmra.mxu1 %vm172_vm0, %v1546_v15 }
  0x1b   :  { %283 = vmatprep.mubr.bf16.mxu0 %v1616_v1  ;;  %363 = vmatprep.mubr.bf16.mxu1 %v1616_v1 }
  0x1c   :  { %723 = vmatpush1.bf16.msra.mxu1 %v1564_v22  ;;  %1417 = vmatprep.subr.bf16.mxu0 %v1604_v20 }
  0x1d   :  { %724 = vmatprep.subr.bf16.mxu1 %v1569_v23 }
  0x20   :  { %725 = vmatpush1.bf16.msra.mxu1 %v1567_v25 }
  0x21   :  { %726 = vmatprep.subr.bf16.mxu1 %v1572_v26 }
  0x22   :  { %1352 = vmatmul.mubr.msk.bf16.gmra.mxu0 %vm172_vm0, %v1539_v18  ;;  %1360 = vmatmul.mubr.msk.bf16.gmra.mxu1 %vm172_vm0, %v1547_v21 }
  0x23   :  { %293 = vmatprep.mubr.bf16.mxu0 %v1616_v1  ;;  %373 = vmatprep.mubr.bf16.mxu1 %v1616_v1 }
  0x24   :  { %727 = vmatpush1.bf16.msra.mxu1 %v1570_v28  ;;  %v1605_v28 = vld [vmem:[%s2234_s5 + $0x28] sm:$0xff]  }
  0x25   :  { %728 = vmatprep.subr.bf16.mxu1 %v1575_v29  ;;  %1418 = vmatpush3.bf16.msra.mxu0 %v1605_v28 }
  0x28   :  { %729 = vmatpush1.bf16.msra.mxu1 %v1573_v31  ;;  %v1606_v31 = vld [vmem:[%s2234_s5 + $0x60] sm:$0xff]  }
  0x29   :  { %730 = vmatprep.subr.bf16.mxu1 %v1578_v32  ;;  %1419 = vmatprep.subr.bf16.mxu0 %v1606_v31 }
  0x2a   :  { %1353 = vmatmul.mubr.msk.bf16.gmra.mxu0 %vm172_vm0, %v1540_v24  ;;  %1361 = vmatmul.mubr.msk.bf16.gmra.mxu1 %vm172_vm0, %v1548_v27 }
  0x2b   :  { %303 = vmatprep.mubr.bf16.mxu0 %v1616_v1  ;;  %383 = vmatprep.mubr.bf16.mxu1 %v1616_v1 }
  0x2c   :  { %731 = vmatpush2.bf16.msra.mxu1 %v1576_v34 }
  0x2d   :  { %732 = vmatprep.subr.bf16.mxu1 %v1581_v35 }
  0x30   :  { %733 = vmatpush2.bf16.msra.mxu1 %v1579_v37 }
  0x31   :  { %734 = vmatprep.subr.bf16.mxu1 %v1584_v38 }
  0x32   :  { %1354 = vmatmul.mubr.msk.bf16.gmra.mxu0 %vm172_vm0, %v1541_v30  ;;  %1362 = vmatmul.mubr.msk.bf16.gmra.mxu1 %vm172_vm0, %v1549_v33 }
  0x33   :  { %313 = vmatprep.mubr.bf16.mxu0 %v1616_v1  ;;  %393 = vmatprep.mubr.bf16.mxu1 %v1616_v1 }
  0x34   :  { %735 = vmatpush2.bf16.msra.mxu1 %v1582_v40 }
  0x35   :  { %736 = vmatprep.subr.bf16.mxu1 %v1587_v41  ;;  %v1608_v41 = vld [vmem:[%s2234_s5 + $0x58] sm:$0xff]  }
  0x38   :  { %737 = vmatpush2.bf16.msra.mxu1 %v1585_v43 }
  0x39   :  { %738 = vmatprep.subr.bf16.mxu1 %v1590_v44 }
  0x3a   :  { %1355 = vmatmul.mubr.msk.bf16.gmra.mxu0 %vm172_vm0, %v1542_v36  ;;  %1363 = vmatmul.mubr.msk.bf16.gmra.mxu1 %vm172_vm0, %v1550_v39  ;;  %v1607_v39 = vld [vmem:[%s2234_s5 + $0x20] sm:$0xff]  }
  0x3b   :  { %323 = vmatprep.mubr.bf16.mxu0 %v1616_v1  ;;  %403 = vmatprep.mubr.bf16.mxu1 %v1616_v1 }
  0x3c   :  { %739 = vmatpush2.bf16.msra.mxu1 %v1588_v46  ;;  %1420 = vmatpush3.bf16.msra.mxu0 %v1607_v39 }
  0x3d   :  { %740 = vmatprep.subr.bf16.mxu1 %v1593_v47  ;;  %1421 = vmatprep.subr.bf16.mxu0 %v1608_v41 }
  0x40   :  { %741 = vmatpush2.bf16.msra.mxu1 %v1591_v48 }
  0x41   :  { %742 = vmatprep.subr.bf16.mxu1 %v1596_v49  ;;  %v1609_v49 = vld [vmem:[%s2234_s5 + $0x18] sm:$0xff]  }
  0x42   :  { %1356 = vmatmul.mubr.msk.bf16.gmra.mxu0 %vm172_vm0, %v1543_v42  ;;  %1364 = vmatmul.mubr.msk.bf16.gmra.mxu1 %vm172_vm0, %v1551_v45 }
  0x43   :  { %1422 = vmatpush3.bf16.msra.mxu0 %v1609_v49 }
  0x44   :  { %743 = vmatpush2.bf16.msra.mxu1 %v1594_v50 }
  0x45   :  { %744 = vmatprep.subr.bf16.mxu1 %v1599_v51  ;;  %v1610_v51 = vld [vmem:[%s2234_s5 + $0x50] sm:$0xff]  }
  0x46   :  { %1423 = vmatprep.subr.bf16.mxu0 %v1610_v51 }
  0x48   :  { %745 = vmatpush2.bf16.msra.mxu1 %v1597_v52 }
  0xca   :  { %v255_v59 = vpop.f32.mrf.mxu0  ;;  %v1856_v63 = vpop.f32.mrf.mxu1 }
  0xcb   :  { %v256_v3 = vadd.f32 %v255_v59, %v1853_v60 }
  0xcc   :  { %v257_v61 = vpop.f32.mrf.mxu0  ;;  %v1859_v2 = vpop.f32.mrf.mxu1 }
  0xcd   :  { %v258_v62 = vadd.f32 %v257_v61, %v1849_v58  ;;  %v414_v15 = vmax.f32 %v256_v3, 0.0 }
  0xce   :  { %v259_v0 = vpop.f32.mrf.mxu0  ;;  %v1863_v7 = vpop.f32.mrf.mxu1 }
  0xcf   :  { %v260_v1 = vadd.f32 %v259_v0, %v1853_v60  ;;  %v415_v5 = vmax.f32 %v258_v62, 0.0 }
  0xd0   :  { %v261_v4 = vpop.f32.mrf.mxu0  ;;  %v1871_v13 = vpop.f32.mrf.mxu1 }
  0xd1   :  { %v262_v6 = vadd.f32 %v261_v4, %v1849_v58  ;;  %v416_v9 = vmax.f32 %v260_v1, 0.0  ;;  %v1611_v1 = vld [vmem:[%s2234_s5 + $0x10] sm:$0xff]   ;;  %v1612_v4 = vld [vmem:[%s2234_s5 + $0x48] sm:$0xff]  }
  0xd2   :  { %v265_v10 = vpop.f32.mrf.mxu0  ;;  %v1879_v19 = vpop.f32.mrf.mxu1  ;;  %1424 = vmatpush3.bf16.msra.mxu0 %v1611_v1 }
  0xd3   :  { %v417_v12 = vmax.f32 %v262_v6, 0.0  ;;  %v478_v21 = vpack.c.bf16 %v416_v9, %v414_v15  ;;  %v266_v26 = vadd.f32 %v265_v10, %v1853_v60  ;;  %1425 = vmatprep.subr.bf16.mxu0 %v1612_v4 }
  0xd4   :  { %v267_v16 = vpop.f32.mrf.mxu0  ;;  %v1886_v25 = vpop.f32.mrf.mxu1 }
  0xd5   :  { %v479_v18 = vpack.c.bf16 %v417_v12, %v415_v5  ;;  %v268_v23 = vadd.f32 %v267_v16, %v1849_v58  ;;  %v418_v37 = vmax.f32 %v266_v26, 0.0 }
  0xd6   :  { %v269_v22 = vpop.f32.mrf.mxu0  ;;  %v1893_v30 = vpop.f32.mrf.mxu1  ;;  %1426 = vmatpush3.bf16.msra.mxu0 %v1613_v14 }
  0xd7   :  { %v270_v24 = vadd.f32 %v269_v22, %v1853_v60  ;;  %746 = vmatprep.mubr.bf16.mxu1 %v479_v18  ;;  %v419_v34 = vmax.f32 %v268_v23, 0.0 }
  0xd8   :  { %v271_v27 = vpop.f32.mrf.mxu0  ;;  %747 = vmatmul.mubr.bf16.vlgmr.msra.gmra.mxu1 %v478_v21  ;;  %v1898_v36 = vpop.f32.mrf.mxu1 }
  0xd9   :  { %v272_v29 = vadd.f32 %v271_v27, %v1849_v58  ;;  %v420_v32 = vmax.f32 %v270_v24, 0.0 }
  0xda   :  { %v275_v33 = vpop.f32.mrf.mxu0  ;;  %v1906_v44 = vpop.f32.mrf.mxu1 }
  0xdb   :  { %v421_v35 = vmax.f32 %v272_v29, 0.0  ;;  %v480_v42 = vpack.c.bf16 %v420_v32, %v418_v37  ;;  %v276_v47 = vadd.f32 %v275_v33, %v1853_v60 }
  0xdc   :  { %v277_v38 = vpop.f32.mrf.mxu0  ;;  %v1918_v56 = vpop.f32.mrf.mxu1 }
  0xdd   :  { %v481_v40 = vpack.c.bf16 %v421_v35, %v419_v34  ;;  %v278_v45 = vadd.f32 %v277_v38, %v1849_v58  ;;  %v422_v62 = vmax.f32 %v276_v47, 0.0 }
  0xde   :  { %v279_v43 = vpop.f32.mrf.mxu0  ;;  %v1926_v8 = vpop.f32.mrf.mxu1 }
  0xdf   :  { %v280_v46 = vadd.f32 %v279_v43, %v1853_v60  ;;  %756 = vmatprep.mubr.bf16.mxu1 %v481_v40  ;;  %v423_v59 = vmax.f32 %v278_v45, 0.0 }
  0xe0   :  { %v281_v48 = vpop.f32.mrf.mxu0  ;;  %757 = vmatmul.mubr.bf16.gmra.mxu1 %v480_v42  ;;  %v1935_v18 = vpop.f32.mrf.mxu1 }
  0xe1   :  { %v282_v50 = vadd.f32 %v281_v48, %v1849_v58  ;;  %v424_v52 = vmax.f32 %v280_v46, 0.0 }
  0xe2   :  { %v285_v53 = vpop.f32.mrf.mxu0  ;;  %v1937_v28 = vpop.f32.mrf.mxu1 }
  0xe3   :  { %v425_v61 = vmax.f32 %v282_v50, 0.0  ;;  %v482_v5 = vpack.c.bf16 %v424_v52, %v422_v62  ;;  %v286_v11 = vadd.f32 %v285_v53, %v1853_v60 }
  0xe4   :  { %v287_v0 = vpop.f32.mrf.mxu0  ;;  %v1943_v38 = vpop.f32.mrf.mxu1 }
  0xe5   :  { %v483_v3 = vpack.c.bf16 %v425_v61, %v423_v59  ;;  %v288_v9 = vadd.f32 %v287_v0, %v1849_v58  ;;  %v426_v22 = vmax.f32 %v286_v11, 0.0 }
  0xe6   :  { %v289_v6 = vpop.f32.mrf.mxu0  ;;  %v1945_v47 = vpop.f32.mrf.mxu1 }
  0xe7   :  { %v290_v10 = vadd.f32 %v289_v6, %v1853_v60  ;;  %766 = vmatprep.mubr.bf16.mxu1 %v483_v3  ;;  %v427_v20 = vmax.f32 %v288_v9, 0.0 }
  0xe8   :  { %v291_v12 = vpop.f32.mrf.mxu0  ;;  %767 = vmatmul.mubr.bf16.gmra.mxu1 %v482_v5  ;;  %v1951_v61 = vpop.f32.mrf.mxu1 }
  0xe9   :  { %v292_v15 = vadd.f32 %v291_v12, %v1849_v58  ;;  %v428_v16 = vmax.f32 %v290_v10, 0.0 }
  0xea   :  { %v295_v17 = vpop.f32.mrf.mxu0  ;;  %v1953_v9 = vpop.f32.mrf.mxu1 }
  0xeb   :  { %v429_v21 = vmax.f32 %v292_v15, 0.0  ;;  %v484_v26 = vpack.c.bf16 %v428_v16, %v426_v22  ;;  %v296_v32 = vadd.f32 %v295_v17, %v1853_v60 }
  0xec   :  { %v297_v23 = vpop.f32.mrf.mxu0 }
  0xed   :  { %v485_v24 = vpack.c.bf16 %v429_v21, %v427_v20  ;;  %v298_v29 = vadd.f32 %v297_v23, %v1849_v58  ;;  %v430_v41 = vmax.f32 %v296_v32, 0.0  ;;  %v1959_v20 = vpop.f32.mrf.mxu1 }
  0xee   :  { %v299_v27 = vpop.f32.mrf.mxu0 }
  0xef   :  { %v300_v31 = vadd.f32 %v299_v27, %v1853_v60  ;;  %776 = vmatprep.mubr.bf16.mxu1 %v485_v24  ;;  %v431_v39 = vmax.f32 %v298_v29, 0.0  ;;  %v338_v27 = vadd.f32 %v1859_v2, %v1849_v58  ;;  %v342_v29 = vadd.f32 %v1871_v13, %v1849_v58 }
  0xf0   :  { %v301_v33 = vpop.f32.mrf.mxu0  ;;  %777 = vmatmul.mubr.bf16.gmra.mxu1 %v484_v26 }
  0xf1   :  { %v302_v34 = vadd.f32 %v301_v33, %v1849_v58  ;;  %v432_v35 = vmax.f32 %v300_v31, 0.0  ;;  %v1965_v33 = vpop.f32.mrf.mxu1  ;;  %v449_v2 = vmax.f32 %v342_v29, 0.0 }
  0xf2   :  { %v305_v37 = vpop.f32.mrf.mxu0 }
  0xf3   :  { %v433_v40 = vmax.f32 %v302_v34, 0.0  ;;  %v486_v45 = vpack.c.bf16 %v432_v35, %v430_v41  ;;  %v306_v50 = vadd.f32 %v305_v37, %v1853_v60 }
  0xf4   :  { %v307_v42 = vpop.f32.mrf.mxu0 }
  0xf5   :  { %v487_v43 = vpack.c.bf16 %v433_v40, %v431_v39  ;;  %v308_v48 = vadd.f32 %v307_v42, %v1849_v58  ;;  %v434_v1 = vmax.f32 %v306_v50, 0.0  ;;  %v447_v40 = vmax.f32 %v338_v27, 0.0 }
  0xf6   :  { %v309_v46 = vpop.f32.mrf.mxu0  ;;  %v348_v50 = vadd.f32 %v1886_v25, %v1849_v58 }
  0xf7   :  { %v310_v49 = vadd.f32 %v309_v46, %v1853_v60  ;;  %786 = vmatprep.mubr.bf16.mxu1 %v487_v43  ;;  %v435_v62 = vmax.f32 %v308_v48, 0.0  ;;  %v381_v43 = vpop.f32.mrf.mxu1 }
  0xf8   :  { %v311_v51 = vpop.f32.mrf.mxu0  ;;  %787 = vmatmul.mubr.bf16.gmra.mxu1 %v486_v45 }
  0xf9   :  { %v312_v52 = vadd.f32 %v311_v51, %v1849_v58  ;;  %v436_v53 = vmax.f32 %v310_v49, 0.0  ;;  %v495_v49 = vpack.c.bf16 %v449_v2, %v447_v40  ;;  %v352_v51 = vadd.f32 %v1898_v36, %v1849_v58 }
  0xfa   :  { %v315_v59 = vpop.f32.mrf.mxu0  ;;  %v358_v36 = vadd.f32 %v1918_v56, %v1849_v58  ;;  %v368_v56 = vadd.f32 %v1943_v38, %v1849_v58  ;;  %v1615_v38 = vld [vmem:[%s2234_s5] sm:$0xff]  }
  0xfb   :  { %v437_v0 = vmax.f32 %v312_v52, 0.0  ;;  %v488_v5 = vpack.c.bf16 %v436_v53, %v434_v1  ;;  %v316_v12 = vadd.f32 %v315_v59, %v1853_v60  ;;  %v336_v52 = vadd.f32 %v1856_v63, %v1853_v60 }
  0xfc   :  { %v317_v3 = vpop.f32.mrf.mxu0  ;;  %v340_v59 = vadd.f32 %v1863_v7, %v1853_v60  ;;  %v453_v1 = vmax.f32 %v352_v51, 0.0  ;;  %v362_v63 = vadd.f32 %v1935_v18, %v1849_v58  ;;  %v346_v7 = vadd.f32 %v1879_v19, %v1853_v60 }
  0xfd   :  { %v489_v4 = vpack.c.bf16 %v437_v0, %v435_v62  ;;  %v318_v10 = vadd.f32 %v317_v3, %v1849_v58  ;;  %v438_v23 = vmax.f32 %v316_v12, 0.0  ;;  %v1979_v62 = vpop.f32.mrf.mxu1  ;;  %v451_v0 = vmax.f32 %v348_v50, 0.0 }
  0xfe   :  { %v319_v6 = vpop.f32.mrf.mxu0  ;;  %v446_v3 = vmax.f32 %v336_v52, 0.0  ;;  %v455_v12 = vmax.f32 %v358_v36, 0.0  ;;  %v372_v18 = vadd.f32 %v1951_v61, %v1849_v58  ;;  %v356_v19 = vadd.f32 %v1906_v44, %v1853_v60 }
  0xff   :  { %v320_v11 = vadd.f32 %v319_v6, %v1853_v60  ;;  %796 = vmatprep.mubr.bf16.mxu1 %v489_v4  ;;  %v439_v21 = vmax.f32 %v318_v10, 0.0  ;;  %v448_v4 = vmax.f32 %v340_v59, 0.0  ;;  %v387_v25 = vpop.f32.mrf.mxu1  ;;  %v350_v10 = vadd.f32 %v1893_v30, %v1853_v60 }
 0x100   :  { %v321_v14 = vpop.f32.mrf.mxu0  ;;  %797 = vmatmul.mubr.bf16.gmra.mxu1 %v488_v5  ;;  %v497_v5 = vpack.c.bf16 %v453_v1, %v451_v0  ;;  %v360_v30 = vadd.f32 %v1926_v8, %v1853_v60  ;;  %v461_v27 = vmax.f32 %v372_v18, 0.0  ;;  %v454_v61 = vmax.f32 %v356_v19, 0.0 }
 0x101   :  { %v322_v15 = vadd.f32 %v321_v14, %v1849_v58  ;;  %v440_v16 = vmax.f32 %v320_v11, 0.0  ;;  %v494_v6 = vpack.c.bf16 %v448_v4, %v446_v3  ;;  %v389_v11 = vpop.f32.mrf.mxu1  ;;  %v457_v14 = vmax.f32 %v362_v63, 0.0 }
 0x102   :  { %v325_v17 = vpop.f32.mrf.mxu0  ;;  %v456_v29 = vmax.f32 %v360_v30, 0.0  ;;  %v378_v8 = vadd.f32 %v1959_v20, %v1849_v58  ;;  %v388_v20 = vadd.f32 %v387_v25, %v1849_v58  ;;  %v390_v4 = vadd.f32 %v389_v11, %v1853_v60 }
 0x103   :  { %v441_v22 = vmax.f32 %v322_v15, 0.0  ;;  %v490_v31 = vpack.c.bf16 %v440_v16, %v438_v23  ;;  %v326_v37 = vadd.f32 %v325_v17, %v1853_v60  ;;  %v450_v15 = vmax.f32 %v346_v7, 0.0  ;;  %v391_v17 = vpop.f32.mrf.mxu1 }
 0x104   :  { %v327_v24 = vpop.f32.mrf.mxu0  ;;  %v452_v16 = vmax.f32 %v350_v10, 0.0  ;;  %v463_v40 = vmax.f32 %v378_v8, 0.0  ;;  %v468_v63 = vmax.f32 %v390_v4, 0.0 }
 0x105   :  { %v491_v26 = vpack.c.bf16 %v441_v22, %v439_v21  ;;  %v328_v34 = vadd.f32 %v327_v24, %v1849_v58  ;;  %v442_v46 = vmax.f32 %v326_v37, 0.0  ;;  %v499_v21 = vpack.c.bf16 %v457_v14, %v455_v12  ;;  %v395_v23 = vpop.f32.mrf.mxu1  ;;  %v1614_v24 = vld [vmem:[%s2234_s5 + $0x40] sm:$0xff]  }
 0x106   :  { %v329_v32 = vpop.f32.mrf.mxu0  ;;  %v496_v22 = vpack.c.bf16 %v452_v16, %v450_v15  ;;  %1427 = vmatprep.subr.bf16.mxu0 %v1614_v24  ;;  %v370_v37 = vadd.f32 %v1945_v47, %v1853_v60  ;;  %v380_v47 = vadd.f32 %v1965_v33, %v1853_v60  ;;  %v396_v15 = vadd.f32 %v395_v23, %v1853_v60  ;;  %v542_v23 = vld [vmem:[%s2235_s4] sm:$0x3] }
 0x107   :  { %v330_v35 = vadd.f32 %v329_v32, %v1853_v60  ;;  %806 = vmatprep.mubr.bf16.mxu1 %v491_v26  ;;  %v443_v13 = vmax.f32 %v328_v34, 0.0  ;;  %v459_v26 = vmax.f32 %v368_v56, 0.0  ;;  %1428 = vmatpush3.bf16.msra.mxu0 %v1615_v38  ;;  %v382_v32 = vadd.f32 %v381_v43, %v1849_v58 }
 0x108   :  { %v331_v39 = vpop.f32.mrf.mxu0  ;;  %807 = vmatmul.mubr.bf16.gmra.mxu1 %v490_v31  ;;  %v397_v31 = vpop.f32.mrf.mxu1  ;;  %v498_v34 = vpack.c.bf16 %v456_v29, %v454_v61  ;;  %v392_v43 = vadd.f32 %v391_v17, %v1849_v58  ;;  %v464_v52 = vmax.f32 %v380_v47, 0.0  ;;  %v470_v17 = vmax.f32 %v396_v15, 0.0 }
 0x109   :  { %v332_v41 = vadd.f32 %v331_v39, %v1849_v58  ;;  %v444_v42 = vmax.f32 %v330_v35, 0.0  ;;  %v501_v44 = vpack.c.bf16 %v461_v27, %v459_v26  ;;  %v366_v35 = vadd.f32 %v1937_v28, %v1853_v60 }
 0x10a   :  { %v399_v39 = vpop.f32.mrf.mxu1  ;;  %v376_v28 = vadd.f32 %v1953_v9, %v1853_v60  ;;  %v469_v50 = vmax.f32 %v392_v43, 0.0  ;;  %v398_v0 = vadd.f32 %v397_v31, %v1849_v58  ;;  %v386_v9 = vadd.f32 %v1979_v62, %v1853_v60 }
 0x10b   :  { %v445_v45 = vmax.f32 %v332_v41, 0.0  ;;  %v492_v53 = vpack.c.bf16 %v444_v42, %v442_v46  ;;  %v465_v41 = vmax.f32 %v382_v32, 0.0  ;;  %v458_v2 = vmax.f32 %v366_v35, 0.0 }
 0x10c   :  { %v460_v42 = vmax.f32 %v370_v37, 0.0  ;;  %v462_v51 = vmax.f32 %v376_v28, 0.0  ;;  %v471_v25 = vmax.f32 %v398_v0, 0.0  ;;  %v466_v36 = vmax.f32 %v386_v9, 0.0 }
 0x10d   :  { %v493_v48 = vpack.c.bf16 %v445_v45, %v443_v13  ;;  %v401_v13 = vpop.f32.mrf.mxu1  ;;  %v503_v45 = vpack.c.bf16 %v465_v41, %v463_v40  ;;  %v400_v62 = vadd.f32 %v399_v39, %v1853_v60  ;;  %v2032_v27 = vrot.slane %v542_v23, %v68_v55 }
 0x10e   :  { %v500_v46 = vpack.c.bf16 %v460_v42, %v458_v2  ;;  %v402_v1 = vadd.f32 %v401_v13, %v1849_v58  ;;  %v502_v3 = vpack.c.bf16 %v464_v52, %v462_v51  ;;  %v504_v14 = vpack.c.bf16 %v468_v63, %v466_v36 }
 0x10f   :  { %816 = vmatprep.mubr.bf16.mxu1 %v493_v48  ;;  %v405_v48 = vpop.f32.mrf.mxu1  ;;  %v2036_v38 = vrot.slane %v542_v23, %v64_v57 }
 0x110   :  { %817 = vmatmul.mubr.bf16.gmra.mxu1 %v492_v53 }
 0x111   :  { %826 = vmatprep.mubr.bf16.mxu1 %v495_v49  ;;  %v467_v49 = vmax.f32 %v388_v20, 0.0  ;;  %v407_v53 = vpop.f32.mrf.mxu1 }
 0x112   :  { %v408_v10 = vadd.f32 %v407_v53, %v1849_v58 }
 0x113   :  { %v505_v59 = vpack.c.bf16 %v469_v50, %v467_v49  ;;  %v409_v33 = vpop.f32.mrf.mxu1 }
 0x114   :  { %v475_v11 = vmax.f32 %v408_v10, 0.0  ;;  %v410_v19 = vadd.f32 %v409_v33, %v1853_v60 }
 0x116   :  { %v476_v30 = vmax.f32 %v410_v19, 0.0 }
 0x118   :  { %827 = vmatmul.mubr.bf16.gmra.mxu1 %v494_v6  ;;  %v411_v6 = vpop.f32.mrf.mxu1 }
 0x119   :  { %836 = vmatprep.mubr.bf16.mxu1 %v497_v5  ;;  %v473_v5 = vmax.f32 %v402_v1, 0.0  ;;  %v412_v12 = vadd.f32 %v411_v6, %v1849_v58 }
 0x11b   :  { %v507_v7 = vpack.c.bf16 %v473_v5, %v471_v25  ;;  %v477_v16 = vmax.f32 %v412_v12, 0.0 }
 0x11d   :  { %v509_v56 = vpack.c.bf16 %v477_v16, %v475_v11 }
 0x120   :  { %837 = vmatmul.mubr.bf16.gmra.mxu1 %v496_v22  ;;  %v406_v22 = vadd.f32 %v405_v48, %v1853_v60 }
 0x121   :  { %846 = vmatprep.mubr.bf16.mxu1 %v499_v21  ;;  %v472_v21 = vmax.f32 %v400_v62, 0.0 }
 0x122   :  { %v474_v58 = vmax.f32 %v406_v22, 0.0 }
 0x123   :  { %v506_v18 = vpack.c.bf16 %v472_v21, %v470_v17 }
 0x124   :  { %v508_v24 = vpack.c.bf16 %v476_v30, %v474_v58 }
 0x128   :  { %847 = vmatmul.mubr.bf16.gmra.mxu1 %v498_v34 }
 0x129   :  { %856 = vmatprep.mubr.bf16.mxu1 %v501_v44 }
 0x130   :  { %857 = vmatmul.mubr.bf16.gmra.mxu1 %v500_v46 }
 0x131   :  { %866 = vmatprep.mubr.bf16.mxu1 %v503_v45 }
 0x138   :  { %867 = vmatmul.mubr.bf16.gmra.mxu1 %v502_v3 }
 0x139   :  { %876 = vmatprep.mubr.bf16.mxu1 %v505_v59 }
 0x140   :  { %877 = vmatmul.mubr.bf16.gmra.mxu1 %v504_v14 }
 0x141   :  { %886 = vmatprep.mubr.bf16.mxu1 %v507_v7 }
 0x148   :  { %887 = vmatmul.mubr.bf16.gmra.mxu1 %v506_v18 }
 0x149   :  { %896 = vmatprep.mubr.bf16.mxu1 %v509_v56 }
 0x150   :  { %897 = vmatmul.mubr.bf16.gmra.mxu1 %v508_v24 }
 0x198   :  { %v748_v26 = vpop.f32.mrf.mxu1 }
 0x199   :  { %v749_v44 = vadd.f32 %v748_v26, %v2036_v38 }
 0x19a   :  { %v750_v60 = vpop.f32.mrf.mxu1 }
 0x19b   :  { %v751_v29 = vadd.f32 %v750_v60, %v2032_v27  ;;  %v907_v39 = vmax.f32 %v749_v44, 0.0 }
 0x19c   :  { %v752_v61 = vpop.f32.mrf.mxu1 }
 0x19d   :  { %v753_v31 = vadd.f32 %v752_v61, %v2036_v38  ;;  %v908_v37 = vmax.f32 %v751_v29, 0.0 }
 0x19e   :  { %v754_v8 = vpop.f32.mrf.mxu1 }
 0x19f   :  { %v755_v32 = vadd.f32 %v754_v8, %v2032_v27  ;;  %v909_v34 = vmax.f32 %v753_v31, 0.0 }
 0x1a0   :  { %v758_v35 = vpop.f32.mrf.mxu1 }
 0x1a1   :  { %v910_v55 = vmax.f32 %v755_v32, 0.0  ;;  %v971_v57 = vpack.c.bf16 %v909_v34, %v907_v39  ;;  %v759_v13 = vadd.f32 %v758_v35, %v2036_v38 }
 0x1a2   :  { %v760_v40 = vpop.f32.mrf.mxu1 }
 0x1a3   :  { %v972_v54 = vpack.c.bf16 %v910_v55, %v908_v37  ;;  %v761_v2 = vadd.f32 %v760_v40, %v2032_v27  ;;  %v911_v48 = vmax.f32 %v759_v13, 0.0 }
 0x1a4   :  { %v762_v41 = vpop.f32.mrf.mxu1 }
 0x1a5   :  { %v763_v42 = vadd.f32 %v762_v41, %v2036_v38  ;;  %1163 = vmatprep.mubr.bf16.mxu0 %v972_v54  ;;  %v912_v28 = vmax.f32 %v761_v2, 0.0 }
 0x1a6   :  { %v764_v45 = vpop.f32.mrf.mxu1  ;;  %1164 = vmatmul.mubr.bf16.vlgmr.msra.gmra.mxu0 %v971_v57 }
 0x1a7   :  { %v765_v20 = vadd.f32 %v764_v45, %v2032_v27  ;;  %v913_v43 = vmax.f32 %v763_v42, 0.0 }
 0x1a8   :  { %v768_v46 = vpop.f32.mrf.mxu1 }
 0x1a9   :  { %v914_v47 = vmax.f32 %v765_v20, 0.0  ;;  %v973_v51 = vpack.c.bf16 %v913_v43, %v911_v48  ;;  %v769_v0 = vadd.f32 %v768_v46, %v2036_v38 }
 0x1aa   :  { %v770_v49 = vpop.f32.mrf.mxu1 }
 0x1ab   :  { %v974_v50 = vpack.c.bf16 %v914_v47, %v912_v28  ;;  %v771_v53 = vadd.f32 %v770_v49, %v2032_v27  ;;  %v915_v5 = vmax.f32 %v769_v0, 0.0 }
 0x1ac   :  { %v772_v52 = vpop.f32.mrf.mxu1 }
 0x1ad   :  { %v773_v59 = vadd.f32 %v772_v52, %v2036_v38  ;;  %1171 = vmatprep.mubr.bf16.mxu0 %v974_v50  ;;  %v916_v33 = vmax.f32 %v771_v53, 0.0 }
 0x1ae   :  { %v774_v1 = vpop.f32.mrf.mxu1  ;;  %1172 = vmatmul.mubr.bf16.gmra.mxu0 %v973_v51 }
 0x1af   :  { %v775_v3 = vadd.f32 %v774_v1, %v2032_v27  ;;  %v917_v9 = vmax.f32 %v773_v59, 0.0 }
 0x1b0   :  { %v778_v4 = vpop.f32.mrf.mxu1 }
 0x1b1   :  { %v918_v25 = vmax.f32 %v775_v3, 0.0  ;;  %v975_v6 = vpack.c.bf16 %v917_v9, %v915_v5  ;;  %v779_v14 = vadd.f32 %v778_v4, %v2036_v38 }
 0x1b2   :  { %v780_v36 = vpop.f32.mrf.mxu1 }
 0x1b3   :  { %v976_v63 = vpack.c.bf16 %v918_v25, %v916_v33  ;;  %v781_v10 = vadd.f32 %v780_v36, %v2032_v27  ;;  %v919_v56 = vmax.f32 %v779_v14, 0.0 }
 0x1b4   :  { %v782_v7 = vpop.f32.mrf.mxu1 }
 0x1b5   :  { %v783_v12 = vadd.f32 %v782_v7, %v2036_v38  ;;  %1179 = vmatprep.mubr.bf16.mxu0 %v976_v63  ;;  %v920_v17 = vmax.f32 %v781_v10, 0.0 }
 0x1b6   :  { %v784_v15 = vpop.f32.mrf.mxu1  ;;  %1180 = vmatmul.mubr.bf16.gmra.mxu0 %v975_v6 }
 0x1b7   :  { %v785_v62 = vadd.f32 %v784_v15, %v2032_v27  ;;  %v921_v11 = vmax.f32 %v783_v12, 0.0 }
 0x1b8   :  { %v788_v16 = vpop.f32.mrf.mxu1 }
 0x1b9   :  { %v922_v21 = vmax.f32 %v785_v62, 0.0  ;;  %v977_v19 = vpack.c.bf16 %v921_v11, %v919_v56  ;;  %v789_v23 = vadd.f32 %v788_v16, %v2036_v38 }
 0x1ba   :  { %v790_v18 = vpop.f32.mrf.mxu1 }
 0x1bb   :  { %v978_v22 = vpack.c.bf16 %v922_v21, %v920_v17  ;;  %v791_v30 = vadd.f32 %v790_v18, %v2032_v27  ;;  %v923_v8 = vmax.f32 %v789_v23, 0.0 }
 0x1bc   :  { %v792_v58 = vpop.f32.mrf.mxu1 }
 0x1bd   :  { %v793_v24 = vadd.f32 %v792_v58, %v2036_v38  ;;  %1187 = vmatprep.mubr.bf16.mxu0 %v978_v22  ;;  %v924_v31 = vmax.f32 %v791_v30, 0.0 }
 0x1be   :  { %v794_v26 = vpop.f32.mrf.mxu1  ;;  %1188 = vmatmul.mubr.bf16.gmra.mxu0 %v977_v19 }
 0x1bf   :  { %v795_v60 = vadd.f32 %v794_v26, %v2032_v27  ;;  %v925_v61 = vmax.f32 %v793_v24, 0.0 }
 0x1c0   :  { %v798_v29 = vpop.f32.mrf.mxu1 }
 0x1c1   :  { %v926_v44 = vmax.f32 %v795_v60, 0.0  ;;  %v979_v35 = vpack.c.bf16 %v925_v61, %v923_v8  ;;  %v799_v40 = vadd.f32 %v798_v29, %v2036_v38 }
 0x1c2   :  { %v800_v32 = vpop.f32.mrf.mxu1 }
 0x1c3   :  { %v980_v34 = vpack.c.bf16 %v926_v44, %v924_v31  ;;  %v801_v55 = vadd.f32 %v800_v32, %v2032_v27  ;;  %v927_v45 = vmax.f32 %v799_v40, 0.0 }
 0x1c4   :  { %v802_v37 = vpop.f32.mrf.mxu1 }
 0x1c5   :  { %v803_v39 = vadd.f32 %v802_v37, %v2036_v38  ;;  %1195 = vmatprep.mubr.bf16.mxu0 %v980_v34  ;;  %v928_v42 = vmax.f32 %v801_v55, 0.0 }
 0x1c6   :  { %v804_v54 = vpop.f32.mrf.mxu1  ;;  %1196 = vmatmul.mubr.bf16.gmra.mxu0 %v979_v35 }
 0x1c7   :  { %v805_v57 = vadd.f32 %v804_v54, %v2032_v27  ;;  %v929_v41 = vmax.f32 %v803_v39, 0.0 }
 0x1c8   :  { %v808_v2 = vpop.f32.mrf.mxu1 }
 0x1c9   :  { %v930_v13 = vmax.f32 %v805_v57, 0.0  ;;  %v981_v46 = vpack.c.bf16 %v929_v41, %v927_v45  ;;  %v809_v49 = vadd.f32 %v808_v2, %v2036_v38 }
 0x1ca   :  { %v810_v20 = vpop.f32.mrf.mxu1 }
 0x1cb   :  { %v982_v43 = vpack.c.bf16 %v930_v13, %v928_v42  ;;  %v811_v47 = vadd.f32 %v810_v20, %v2032_v27  ;;  %v931_v1 = vmax.f32 %v809_v49, 0.0 }
 0x1cc   :  { %v812_v28 = vpop.f32.mrf.mxu1 }
 0x1cd   :  { %v813_v48 = vadd.f32 %v812_v28, %v2036_v38  ;;  %1203 = vmatprep.mubr.bf16.mxu0 %v982_v43  ;;  %v932_v59 = vmax.f32 %v811_v47, 0.0 }
 0x1ce   :  { %v814_v50 = vpop.f32.mrf.mxu1  ;;  %1204 = vmatmul.mubr.bf16.gmra.mxu0 %v981_v46 }
 0x1cf   :  { %v815_v51 = vadd.f32 %v814_v50, %v2032_v27  ;;  %v933_v52 = vmax.f32 %v813_v48, 0.0 }
 0x1d0   :  { %v818_v53 = vpop.f32.mrf.mxu1 }
 0x1d1   :  { %v934_v0 = vmax.f32 %v815_v51, 0.0  ;;  %v983_v4 = vpack.c.bf16 %v933_v52, %v931_v1  ;;  %v819_v36 = vadd.f32 %v818_v53, %v2036_v38 }
 0x1d2   :  { %v820_v3 = vpop.f32.mrf.mxu1 }
 0x1d3   :  { %v984_v9 = vpack.c.bf16 %v934_v0, %v932_v59  ;;  %v821_v25 = vadd.f32 %v820_v3, %v2032_v27  ;;  %v935_v15 = vmax.f32 %v819_v36, 0.0 }
 0x1d4   :  { %v822_v33 = vpop.f32.mrf.mxu1 }
 0x1d5   :  { %v823_v5 = vadd.f32 %v822_v33, %v2036_v38  ;;  %1211 = vmatprep.mubr.bf16.mxu0 %v984_v9  ;;  %v936_v12 = vmax.f32 %v821_v25, 0.0 }
 0x1d6   :  { %v824_v63 = vpop.f32.mrf.mxu1  ;;  %1212 = vmatmul.mubr.bf16.gmra.mxu0 %v983_v4 }
 0x1d7   :  { %v825_v6 = vadd.f32 %v824_v63, %v2032_v27  ;;  %v937_v7 = vmax.f32 %v823_v5, 0.0 }
 0x1d8   :  { %v828_v10 = vpop.f32.mrf.mxu1 }
 0x1d9   :  { %v938_v14 = vmax.f32 %v825_v6, 0.0  ;;  %v985_v16 = vpack.c.bf16 %v937_v7, %v935_v15  ;;  %v829_v18 = vadd.f32 %v828_v10, %v2036_v38 }
 0x1da   :  { %v830_v62 = vpop.f32.mrf.mxu1 }
 0x1db   :  { %v986_v11 = vpack.c.bf16 %v938_v14, %v936_v12  ;;  %v831_v21 = vadd.f32 %v830_v62, %v2032_v27  ;;  %v939_v26 = vmax.f32 %v829_v18, 0.0 }
 0x1dc   :  { %v832_v17 = vpop.f32.mrf.mxu1 }
 0x1dd   :  { %v833_v56 = vadd.f32 %v832_v17, %v2036_v38  ;;  %1219 = vmatprep.mubr.bf16.mxu0 %v986_v11  ;;  %v940_v24 = vmax.f32 %v831_v21, 0.0 }
 0x1de   :  { %v834_v22 = vpop.f32.mrf.mxu1  ;;  %1220 = vmatmul.mubr.bf16.gmra.mxu0 %v985_v16 }
 0x1df   :  { %v835_v19 = vadd.f32 %v834_v22, %v2032_v27  ;;  %v941_v58 = vmax.f32 %v833_v56, 0.0 }
 0x1e0   :  { %v838_v30 = vpop.f32.mrf.mxu1 }
 0x1e1   :  { %v942_v23 = vmax.f32 %v835_v19, 0.0  ;;  %v987_v29 = vpack.c.bf16 %v941_v58, %v939_v26  ;;  %v839_v32 = vadd.f32 %v838_v30, %v2036_v38 }
 0x1e2   :  { %v840_v60 = vpop.f32.mrf.mxu1 }
 0x1e3   :  { %v988_v61 = vpack.c.bf16 %v942_v23, %v940_v24  ;;  %v841_v44 = vadd.f32 %v840_v60, %v2032_v27  ;;  %v943_v54 = vmax.f32 %v839_v32, 0.0 }
 0x1e4   :  { %v842_v31 = vpop.f32.mrf.mxu1 }
 0x1e5   :  { %v843_v8 = vadd.f32 %v842_v31, %v2036_v38  ;;  %1227 = vmatprep.mubr.bf16.mxu0 %v988_v61  ;;  %v944_v39 = vmax.f32 %v841_v44, 0.0 }
 0x1e6   :  { %v844_v34 = vpop.f32.mrf.mxu1  ;;  %1228 = vmatmul.mubr.bf16.gmra.mxu0 %v987_v29 }
 0x1e7   :  { %v845_v35 = vadd.f32 %v844_v34, %v2032_v27  ;;  %v945_v37 = vmax.f32 %v843_v8, 0.0 }
 0x1e8   :  { %v848_v55 = vpop.f32.mrf.mxu1 }
 0x1e9   :  { %v946_v40 = vmax.f32 %v845_v35, 0.0  ;;  %v989_v2 = vpack.c.bf16 %v945_v37, %v943_v54  ;;  %v849_v20 = vadd.f32 %v848_v55, %v2036_v38 }
 0x1ea   :  { %v850_v57 = vpop.f32.mrf.mxu1 }
 0x1eb   :  { %v990_v41 = vpack.c.bf16 %v946_v40, %v944_v39  ;;  %v851_v13 = vadd.f32 %v850_v57, %v2032_v27  ;;  %v947_v50 = vmax.f32 %v849_v20, 0.0 }
 0x1ec   :  { %v852_v42 = vpop.f32.mrf.mxu1 }
 0x1ed   :  { %v853_v45 = vadd.f32 %v852_v42, %v2036_v38  ;;  %1235 = vmatprep.mubr.bf16.mxu0 %v990_v41  ;;  %v948_v48 = vmax.f32 %v851_v13, 0.0 }
 0x1ee   :  { %v854_v43 = vpop.f32.mrf.mxu1  ;;  %1236 = vmatmul.mubr.bf16.gmra.mxu0 %v989_v2 }
 0x1ef   :  { %v855_v46 = vadd.f32 %v854_v43, %v2032_v27  ;;  %v949_v28 = vmax.f32 %v853_v45, 0.0 }
 0x1f0   :  { %v858_v47 = vpop.f32.mrf.mxu1 }
 0x1f1   :  { %v950_v49 = vmax.f32 %v855_v46, 0.0  ;;  %v991_v53 = vpack.c.bf16 %v949_v28, %v947_v50  ;;  %v859_v3 = vadd.f32 %v858_v47, %v2036_v38 }
 0x1f2   :  { %v860_v51 = vpop.f32.mrf.mxu1 }
 0x1f3   :  { %v992_v52 = vpack.c.bf16 %v950_v49, %v948_v48  ;;  %v861_v0 = vadd.f32 %v860_v51, %v2032_v27  ;;  %v951_v63 = vmax.f32 %v859_v3, 0.0 }
 0x1f4   :  { %v862_v59 = vpop.f32.mrf.mxu1 }
 0x1f5   :  { %v863_v1 = vadd.f32 %v862_v59, %v2036_v38  ;;  %1243 = vmatprep.mubr.bf16.mxu0 %v992_v52  ;;  %v952_v5 = vmax.f32 %v861_v0, 0.0 }
 0x1f6   :  { %v864_v9 = vpop.f32.mrf.mxu1  ;;  %1244 = vmatmul.mubr.bf16.gmra.mxu0 %v991_v53 }
 0x1f7   :  { %v865_v4 = vadd.f32 %v864_v9, %v2032_v27  ;;  %v953_v33 = vmax.f32 %v863_v1, 0.0 }
 0x1f8   :  { %v868_v25 = vpop.f32.mrf.mxu1 }
 0x1f9   :  { %v954_v36 = vmax.f32 %v865_v4, 0.0  ;;  %v993_v10 = vpack.c.bf16 %v953_v33, %v951_v63  ;;  %v869_v62 = vadd.f32 %v868_v25, %v2036_v38 }
 0x1fa   :  { %v870_v6 = vpop.f32.mrf.mxu1 }
 0x1fb   :  { %v994_v7 = vpack.c.bf16 %v954_v36, %v952_v5  ;;  %v871_v14 = vadd.f32 %v870_v6, %v2032_v27  ;;  %v955_v22 = vmax.f32 %v869_v62, 0.0 }
 0x1fc   :  { %v872_v12 = vpop.f32.mrf.mxu1 }
 0x1fd   :  { %v873_v15 = vadd.f32 %v872_v12, %v2036_v38  ;;  %1251 = vmatprep.mubr.bf16.mxu0 %v994_v7  ;;  %v956_v56 = vmax.f32 %v871_v14, 0.0 }
 0x1fe   :  { %v874_v11 = vpop.f32.mrf.mxu1  ;;  %1252 = vmatmul.mubr.bf16.gmra.mxu0 %v993_v10 }
 0x1ff   :  { %v875_v16 = vadd.f32 %v874_v11, %v2032_v27  ;;  %v957_v17 = vmax.f32 %v873_v15, 0.0 }
 0x200   :  { %v878_v21 = vpop.f32.mrf.mxu1 }
 0x201   :  { %v958_v18 = vmax.f32 %v875_v16, 0.0  ;;  %v995_v30 = vpack.c.bf16 %v957_v17, %v955_v22  ;;  %v879_v60 = vadd.f32 %v878_v21, %v2036_v38 }
 0x202   :  { %v880_v19 = vpop.f32.mrf.mxu1 }
 0x203   :  { %v996_v58 = vpack.c.bf16 %v958_v18, %v956_v56  ;;  %v881_v23 = vadd.f32 %v880_v19, %v2032_v27  ;;  %v959_v34 = vmax.f32 %v879_v60, 0.0 }
 0x204   :  { %v882_v24 = vpop.f32.mrf.mxu1 }
 0x205   :  { %v883_v26 = vadd.f32 %v882_v24, %v2036_v38  ;;  %1259 = vmatprep.mubr.bf16.mxu0 %v996_v58  ;;  %v960_v8 = vmax.f32 %v881_v23, 0.0 }
 0x206   :  { %v884_v61 = vpop.f32.mrf.mxu1  ;;  %1260 = vmatmul.mubr.bf16.gmra.mxu0 %v995_v30 }
 0x207   :  { %v885_v29 = vadd.f32 %v884_v61, %v2032_v27  ;;  %v961_v31 = vmax.f32 %v883_v26, 0.0 }
 0x208   :  { %v888_v44 = vpop.f32.mrf.mxu1 }
 0x209   :  { %v962_v32 = vmax.f32 %v885_v29, 0.0  ;;  %v997_v55 = vpack.c.bf16 %v961_v31, %v959_v34  ;;  %v889_v57 = vadd.f32 %v888_v44, %v2036_v38 }
 0x20a   :  { %v890_v35 = vpop.f32.mrf.mxu1 }
 0x20b   :  { %v998_v37 = vpack.c.bf16 %v962_v32, %v960_v8  ;;  %v891_v40 = vadd.f32 %v890_v35, %v2032_v27  ;;  %v963_v43 = vmax.f32 %v889_v57, 0.0 }
 0x20c   :  { %v892_v39 = vpop.f32.mrf.mxu1 }
 0x20d   :  { %v893_v54 = vadd.f32 %v892_v39, %v2036_v38  ;;  %1267 = vmatprep.mubr.bf16.mxu0 %v998_v37  ;;  %v964_v45 = vmax.f32 %v891_v40, 0.0 }
 0x20e   :  { %v894_v41 = vpop.f32.mrf.mxu1  ;;  %1268 = vmatmul.mubr.bf16.gmra.mxu0 %v997_v55 }
 0x20f   :  { %v895_v2 = vadd.f32 %v894_v41, %v2032_v27  ;;  %v965_v42 = vmax.f32 %v893_v54, 0.0 }
 0x210   :  { %v898_v13 = vpop.f32.mrf.mxu1 }
 0x211   :  { %v966_v20 = vmax.f32 %v895_v2, 0.0  ;;  %v999_v47 = vpack.c.bf16 %v965_v42, %v963_v43  ;;  %v899_v51 = vadd.f32 %v898_v13, %v2036_v38 }
 0x212   :  { %v900_v46 = vpop.f32.mrf.mxu1 }
 0x213   :  { %v1000_v28 = vpack.c.bf16 %v966_v20, %v964_v45  ;;  %v901_v49 = vadd.f32 %v900_v46, %v2032_v27  ;;  %v967_v3 = vmax.f32 %v899_v51, 0.0 }
 0x214   :  { %v902_v48 = vpop.f32.mrf.mxu1 }
 0x215   :  { %v903_v50 = vadd.f32 %v902_v48, %v2036_v38  ;;  %1275 = vmatprep.mubr.bf16.mxu0 %v1000_v28  ;;  %v968_v0 = vmax.f32 %v901_v49, 0.0 }
 0x216   :  { %v904_v52 = vpop.f32.mrf.mxu1  ;;  %1276 = vmatmul.mubr.bf16.gmra.mxu0 %v999_v47 }
 0x217   :  { %v905_v53 = vadd.f32 %v904_v52, %v2032_v27  ;;  %v969_v59 = vmax.f32 %v903_v50, 0.0 }
 0x219   :  { %v970_v1 = vmax.f32 %v905_v53, 0.0  ;;  %v1001_v4 = vpack.c.bf16 %v969_v59, %v967_v3 }
 0x21b   :  { %v1002_v9 = vpack.c.bf16 %v970_v1, %v968_v0 }
 0x21d   :  { %1283 = vmatprep.mubr.bf16.mxu0 %v1002_v9 }
 0x21e   :  { %1284 = vmatmul.mubr.bf16.gmra.mxu0 %v1001_v4 }
 0x266   :  { %v1429_v33 = vpop.f32.mrf.mxu0 }
 0x268   :  { %v1430_v25 = vpop.f32.mrf.mxu0 }
 0x269   :  { %v1431_v5 = vadd.f32 %v1430_v25, %v1429_v33 }
 0x26a   :  { %v1432_v36 = vpop.f32.mrf.mxu0 }
 0x26b   :  { %1293 = vst.msk [vmem:[%s2236_s6] sm:$0xff] %vm1292_vm1, %v1431_v5 }
 0x26c   :  { %v1433_v38 = vpop.f32.mrf.mxu0 }
 0x26d   :  { %v1434_v27 = vadd.f32 %v1433_v38, %v1432_v36 }
 0x26e   :  { %v1435_v63 = vpop.f32.mrf.mxu0 }
 0x26f   :  { %1294 = vst.msk [vmem:[%s2236_s6 + $0x8] sm:$0xff] %vm1292_vm1, %v1434_v27 }
 0x270   :  { %v1436_v6 = vpop.f32.mrf.mxu0 }
 0x271   :  { %v1437_v7 = vadd.f32 %v1436_v6, %v1435_v63 }
 0x272   :  { %v1438_v10 = vpop.f32.mrf.mxu0 }
 0x273   :  { %1295 = vst.msk [vmem:[%s2236_s6 + $0x10] sm:$0xff] %vm1292_vm1, %v1437_v7 }
 0x274   :  { %v1439_v12 = vpop.f32.mrf.mxu0 }
 0x275   :  { %v1440_v14 = vadd.f32 %v1439_v12, %v1438_v10 }
 0x276   :  { %v1441_v15 = vpop.f32.mrf.mxu0 }
 0x277   :  { %1296 = vst.msk [vmem:[%s2236_s6 + $0x18] sm:$0xff] %vm1292_vm1, %v1440_v14 }
 0x278   :  { %v1442_v62 = vpop.f32.mrf.mxu0 }
 0x279   :  { %v1443_v11 = vadd.f32 %v1442_v62, %v1441_v15 }
 0x27a   :  { %v1444_v16 = vpop.f32.mrf.mxu0 }
 0x27b   :  { %1297 = vst.msk [vmem:[%s2236_s6 + $0x20] sm:$0xff] %vm1292_vm1, %v1443_v11 }
 0x27c   :  { %v1445_v17 = vpop.f32.mrf.mxu0 }
 0x27d   :  { %v1446_v21 = vadd.f32 %v1445_v17, %v1444_v16 }
 0x27e   :  { %v1447_v56 = vpop.f32.mrf.mxu0 }
 0x27f   :  { %1298 = vst.msk [vmem:[%s2236_s6 + $0x28] sm:$0xff] %vm1292_vm1, %v1446_v21 }
 0x280   :  { %v1448_v18 = vpop.f32.mrf.mxu0 }
 0x281   :  { %v1449_v22 = vadd.f32 %v1448_v18, %v1447_v56 }
 0x282   :  { %v1450_v19 = vpop.f32.mrf.mxu0 }
 0x283   :  { %1299 = vst.msk [vmem:[%s2236_s6 + $0x30] sm:$0xff] %vm1292_vm1, %v1449_v22 }
 0x284   :  { %v1451_v58 = vpop.f32.mrf.mxu0 }
 0x285   :  { %v1452_v30 = vadd.f32 %v1451_v58, %v1450_v19 }
 0x286   :  { %v1453_v24 = vpop.f32.mrf.mxu0 }
 0x287   :  { %1300 = vst.msk [vmem:[%s2236_s6 + $0x38] sm:$0xff] %vm1292_vm1, %v1452_v30 }
 0x288   :  { %v1454_v23 = vpop.f32.mrf.mxu0 }
 0x289   :  { %v1455_v26 = vadd.f32 %v1454_v23, %v1453_v24 }
 0x28a   :  { %v1456_v60 = vpop.f32.mrf.mxu0 }
 0x28b   :  { %1301 = vst.msk [vmem:[%s2236_s6 + $0x40] sm:$0xff] %vm1292_vm1, %v1455_v26 }
 0x28c   :  { %v1457_v61 = vpop.f32.mrf.mxu0 }
 0x28d   :  { %v1458_v29 = vadd.f32 %v1457_v61, %v1456_v60 }
 0x28e   :  { %v1459_v31 = vpop.f32.mrf.mxu0 }
 0x28f   :  { %1302 = vst.msk [vmem:[%s2236_s6 + $0x48] sm:$0xff] %vm1292_vm1, %v1458_v29 }
 0x290   :  { %v1460_v44 = vpop.f32.mrf.mxu0 }
 0x291   :  { %v1461_v8 = vadd.f32 %v1460_v44, %v1459_v31 }
 0x292   :  { %v1462_v32 = vpop.f32.mrf.mxu0 }
 0x293   :  { %1303 = vst.msk [vmem:[%s2236_s6 + $0x50] sm:$0xff] %vm1292_vm1, %v1461_v8 }
 0x294   :  { %v1463_v34 = vpop.f32.mrf.mxu0 }
 0x295   :  { %v1464_v35 = vadd.f32 %v1463_v34, %v1462_v32 }
 0x296   :  { %v1465_v37 = vpop.f32.mrf.mxu0 }
 0x297   :  { %1304 = vst.msk [vmem:[%s2236_s6 + $0x58] sm:$0xff] %vm1292_vm1, %v1464_v35 }
 0x298   :  { %v1466_v55 = vpop.f32.mrf.mxu0 }
 0x299   :  { %v1467_v39 = vadd.f32 %v1466_v55, %v1465_v37 }
 0x29a   :  { %v1468_v40 = vpop.f32.mrf.mxu0 }
 0x29b   :  { %1305 = vst.msk [vmem:[%s2236_s6 + $0x60] sm:$0xff] %vm1292_vm1, %v1467_v39 }
 0x29c   :  { %v1469_v54 = vpop.f32.mrf.mxu0 }
 0x29d   :  { %v1470_v57 = vadd.f32 %v1469_v54, %v1468_v40 }
 0x29e   :  { %v1471_v41 = vpop.f32.mrf.mxu0 }
 0x29f   :  { %1306 = vst.msk [vmem:[%s2236_s6 + $0x68] sm:$0xff] %vm1292_vm1, %v1470_v57 }
 0x2a0   :  { %v1472_v2 = vpop.f32.mrf.mxu0 }
 0x2a1   :  { %v1473_v42 = vadd.f32 %v1472_v2, %v1471_v41 }
 0x2a2   :  { %v1474_v13 = vpop.f32.mrf.mxu0 }
 0x2a3   :  { %1307 = vst.msk [vmem:[%s2236_s6 + $0x70] sm:$0xff] %vm1292_vm1, %v1473_v42 }
 0x2a4   :  { %v1475_v45 = vpop.f32.mrf.mxu0 }
 0x2a5   :  { %v1476_v20 = vadd.f32 %v1475_v45, %v1474_v13 }
 0x2a6   :  { %v1477_v43 = vpop.f32.mrf.mxu0 }
 0x2a7   :  { %1308 = vst.msk [vmem:[%s2236_s6 + $0x78] sm:$0xff] %vm1292_vm1, %v1476_v20 }
 0x2a8   :  { %v1478_v46 = vpop.f32.mrf.mxu0 }
 0x2a9   :  { %v1479_v28 = vadd.f32 %v1478_v46, %v1477_v43 }
 0x2aa   :  { %v1480_v47 = vpop.f32.mrf.mxu0 }
 0x2ab   :  { %1309 = vst.msk [vmem:[%s2236_s6 + $0x80] sm:$0xff] %vm1292_vm1, %v1479_v28 }
 0x2ac   :  { %v1481_v48 = vpop.f32.mrf.mxu0 }
 0x2ad   :  { %v1482_v49 = vadd.f32 %v1481_v48, %v1480_v47 }
 0x2ae   :  { %v1483_v50 = vpop.f32.mrf.mxu0 }
 0x2af   :  { %1310 = vst.msk [vmem:[%s2236_s6 + $0x88] sm:$0xff] %vm1292_vm1, %v1482_v49 }
 0x2b0   :  { %v1484_v51 = vpop.f32.mrf.mxu0 }
 0x2b1   :  { %v1485_v52 = vadd.f32 %v1484_v51, %v1483_v50 }
 0x2b2   :  { %v1486_v53 = vpop.f32.mrf.mxu0 }
 0x2b3   :  { %1311 = vst.msk [vmem:[%s2236_s6 + $0x90] sm:$0xff] %vm1292_vm1, %v1485_v52 }
 0x2b4   :  { %v1487_v59 = vpop.f32.mrf.mxu0 }
 0x2b5   :  { %v1488_v0 = vadd.f32 %v1487_v59, %v1486_v53 }
 0x2b6   :  { %v1489_v1 = vpop.f32.mrf.mxu0 }
 0x2b7   :  { %1312 = vst.msk [vmem:[%s2236_s6 + $0x98] sm:$0xff] %vm1292_vm1, %v1488_v0 }
 0x2b8   :  { %v1490_v3 = vpop.f32.mrf.mxu0 }
 0x2b9   :  { %v1491_v9 = vadd.f32 %v1490_v3, %v1489_v1 }
 0x2ba   :  { %v1492_v4 = vpop.f32.mrf.mxu0 }
 0x2bb   :  { %1313 = vst.msk [vmem:[%s2236_s6 + $0xa0] sm:$0xff] %vm1292_vm1, %v1491_v9 }
 0x2bc   :  { %v1493_v33 = vpop.f32.mrf.mxu0 }
 0x2bd   :  { %v1494_v25 = vadd.f32 %v1493_v33, %v1492_v4 }
 0x2be   :  { %v1495_v5 = vpop.f32.mrf.mxu0 }
 0x2bf   :  { %1314 = vst.msk [vmem:[%s2236_s6 + $0xa8] sm:$0xff] %vm1292_vm1, %v1494_v25 }
 0x2c0   :  { %v1496_v36 = vpop.f32.mrf.mxu0 }
 0x2c1   :  { %v1497_v38 = vadd.f32 %v1496_v36, %v1495_v5 }
 0x2c2   :  { %v1498_v27 = vpop.f32.mrf.mxu0 }
 0x2c3   :  { %1315 = vst.msk [vmem:[%s2236_s6 + $0xb0] sm:$0xff] %vm1292_vm1, %v1497_v38 }
 0x2c4   :  { %v1499_v63 = vpop.f32.mrf.mxu0 }
 0x2c5   :  { %v1500_v6 = vadd.f32 %v1499_v63, %v1498_v27 }
 0x2c6   :  { %v1501_v7 = vpop.f32.mrf.mxu0 }
 0x2c7   :  { %1316 = vst.msk [vmem:[%s2236_s6 + $0xb8] sm:$0xff] %vm1292_vm1, %v1500_v6 }
 0x2c8   :  { %v1502_v10 = vpop.f32.mrf.mxu0 }
 0x2c9   :  { %v1503_v12 = vadd.f32 %v1502_v10, %v1501_v7 }
 0x2ca   :  { %v1504_v14 = vpop.f32.mrf.mxu0 }
 0x2cb   :  { %1317 = vst.msk [vmem:[%s2236_s6 + $0xc0] sm:$0xff] %vm1292_vm1, %v1503_v12 }
 0x2cc   :  { %v1505_v15 = vpop.f32.mrf.mxu0 }
 0x2cd   :  { %v1506_v62 = vadd.f32 %v1505_v15, %v1504_v14 }
 0x2ce   :  { %v1507_v11 = vpop.f32.mrf.mxu0 }
 0x2cf   :  { %1318 = vst.msk [vmem:[%s2236_s6 + $0xc8] sm:$0xff] %vm1292_vm1, %v1506_v62 }
 0x2d0   :  { %v1508_v16 = vpop.f32.mrf.mxu0 }
 0x2d1   :  { %v1509_v17 = vadd.f32 %v1508_v16, %v1507_v11 }
 0x2d2   :  { %v1510_v21 = vpop.f32.mrf.mxu0 }
 0x2d3   :  { %1319 = vst.msk [vmem:[%s2236_s6 + $0xd0] sm:$0xff] %vm1292_vm1, %v1509_v17 }
 0x2d4   :  { %v1511_v56 = vpop.f32.mrf.mxu0 }
 0x2d5   :  { %v1512_v18 = vadd.f32 %v1511_v56, %v1510_v21 }
 0x2d6   :  { %v1513_v22 = vpop.f32.mrf.mxu0 }
 0x2d7   :  { %1320 = vst.msk [vmem:[%s2236_s6 + $0xd8] sm:$0xff] %vm1292_vm1, %v1512_v18 }
 0x2d8   :  { %v1514_v19 = vpop.f32.mrf.mxu0 }
 0x2d9   :  { %v1515_v58 = vadd.f32 %v1514_v19, %v1513_v22 }
 0x2da   :  { %v1516_v30 = vpop.f32.mrf.mxu0 }
 0x2db   :  { %1321 = vst.msk [vmem:[%s2236_s6 + $0xe0] sm:$0xff] %vm1292_vm1, %v1515_v58 }
 0x2dc   :  { %v1517_v24 = vpop.f32.mrf.mxu0 }
 0x2dd   :  { %v1518_v23 = vadd.f32 %v1517_v24, %v1516_v30 }
 0x2de   :  { %v1519_v26 = vpop.f32.mrf.mxu0 }
 0x2df   :  { %1322 = vst.msk [vmem:[%s2236_s6 + $0xe8] sm:$0xff] %vm1292_vm1, %v1518_v23 }
 0x2e0   :  { %v1520_v60 = vpop.f32.mrf.mxu0 }
 0x2e1   :  { %v1521_v61 = vadd.f32 %v1520_v60, %v1519_v26 }
 0x2e2   :  { %v1522_v29 = vpop.f32.mrf.mxu0 }
 0x2e3   :  { %1323 = vst.msk [vmem:[%s2236_s6 + $0xf0] sm:$0xff] %vm1292_vm1, %v1521_v61 }
 0x2e4   :  { %v1523_v31 = vpop.f32.mrf.mxu0 }
 0x2e5   :  { %v1524_v44 = vadd.f32 %v1523_v31, %v1522_v29 }
 0x2e7   :  { %1324 = vst.msk [vmem:[%s2236_s6 + $0xf8] sm:$0xff] %vm1292_vm1, %v1524_v44 }

</bundles_post_ra>
